<compile_context>
chip_gen: v7x
topology: tpu7x:2x2x1
jax: 0.10.0
libtpu: 0.0.40
codegen_flags: <defaults>
</compile_context>

<pallas_src>
import functools

import jax
import jax.numpy as jnp
from jax.experimental import pallas as pl
from jax.experimental.pallas import tpu as pltpu


# ----------------------------- Pallas kernel ------------------------------- #

def _assemble_prompts_kernel(tmpl_ref, ctx_pos_ref, ctx_neg_ref, ctx_sub_ref,
                             out_ref, *, ctx_lane_start, ctx_lane_size,
                             group_sizes):
    """Build flat prompt embeddings from a static template + learnable ctx.

    tmpl_ref : (N, L*D)       static prefix/suffix template (zeros in ctx slots)
    ctx_*    : (g_i, n_ctx*D) learnable contexts, sum(g_i) == N
    out_ref  : (N, L*D)
    """
    # Single full-tile, lane-dense, unmasked store of all static content
    # (prefix + suffix embeddings).
    out_ref[...] = tmpl_ref[...]

    # Exactly one sliced overlay store per ctx group (3 total), covering the
    # contiguous lane range [D, D*(1+n_ctx)) of the flattened (L*D) axis.
    off = 0
    for ctx_ref, g in zip((ctx_pos_ref, ctx_neg_ref, ctx_sub_ref), group_sizes):
        out_ref[pl.ds(off, g), pl.ds(ctx_lane_start, ctx_lane_size)] = ctx_ref[...]
        off += g


def assemble_prompts(template_flat, ctx_pos, ctx_neg, ctx_sub, *, n_ctx, ctx_dim):
    """Merge learnable ctx into the static flat prompt template with Pallas.

    template_flat: (N, L*D); ctx_*: (g_i, n_ctx*D) -> (N, L*D)

    The whole problem is a few KB, so it runs as one collapsed grid step with
    every operand mapped whole into VMEM — no tiling, no pipeline overhead.
    """
    N, LD = template_flat.shape
    group_sizes = (ctx_pos.shape[0], ctx_neg.shape[0], ctx_sub.shape[0])
    assert sum(group_sizes) == N
    # Guard against silent downcast of the learnable context.
    for c in (ctx_pos, ctx_neg, ctx_sub):
        assert c.dtype == template_flat.dtype, (c.dtype, template_flat.dtype)
        assert c.shape[1] == n_ctx * ctx_dim

    kernel = functools.partial(
        _assemble_prompts_kernel,
        ctx_lane_start=ctx_dim,           # seq position 1 in the flat layout
        ctx_lane_size=n_ctx * ctx_dim,
        group_sizes=group_sizes,
    )

    itemsize = jnp.dtype(template_flat.dtype).itemsize
    bytes_accessed = (2 * N * LD + sum(group_sizes) * n_ctx * ctx_dim) * itemsize

    vmem_spec = pl.BlockSpec(memory_space=pltpu.MemorySpace.VMEM)
    return pl.pallas_call(
        kernel,
        out_shape=jax.ShapeDtypeStruct((N, LD), template_flat.dtype),
        in_specs=[vmem_spec, vmem_spec, vmem_spec, vmem_spec],
        out_specs=vmem_spec,
        cost_estimate=pl.CostEstimate(
            flops=0, transcendentals=0, bytes_accessed=bytes_accessed),
    )(template_flat, ctx_pos, ctx_neg, ctx_sub)


# ----------------------------- Module (JAX glue) --------------------------- #

class CustomAnomalyCLIPPromptLearner2:
    """JAX re-implementation with deterministic synthetic parameters."""

    def __init__(self, key, *, n_cls=1, prompt_length=4, ctx_dim=32,
                 context_length=16, learnable_text_embedding_length=4,
                 learnable_text_embedding_depth=3, vocab_size=64,
                 dtype=jnp.float32):
        self.n_cls = n_cls
        self.n_ctx = prompt_length
        self.ctx_dim = ctx_dim
        self.context_length = context_length
        self.normal_num = 1            # ['{}']
        self.anomaly_num = 1           # ['damaged {}']
        self.anomaly_subtype_num = 1   # ['anomaly type of']
        self.text_encoder_n_ctx = learnable_text_embedding_length
        self.compound_prompts_depth = learnable_text_embedding_depth

        keys = jax.random.split(key, 8)

        # learnable class-specific contexts (nn.init.normal_(std=0.02))
        self.ctx_pos = 0.02 * jax.random.normal(
            keys[0], (n_cls, self.normal_num, self.n_ctx, ctx_dim), dtype)
        self.ctx_neg = 0.02 * jax.random.normal(
            keys[1], (n_cls, self.anomaly_num, self.n_ctx, ctx_dim), dtype)
        self.ctx_anomaly_subtype = 0.02 * jax.random.normal(
            keys[2], (n_cls, self.anomaly_subtype_num, self.n_ctx, ctx_dim), dtype)

        # compound prompts (list of (text_encoder_n_ctx, ctx_dim) params)
        cp_keys = jax.random.split(keys[3], max(self.compound_prompts_depth - 1, 1))
        self.compound_prompts_text = [
            0.02 * jax.random.normal(cp_keys[i],
                                     (self.text_encoder_n_ctx, ctx_dim), dtype)
            for i in range(self.compound_prompts_depth - 1)
        ]
        # TODO(synk): compound_prompt_projections (Linear ctx_dim->896) are defined
        # in the PyTorch __init__ but never used in forward; omitted here.

        # synthetic token embedding table (stands in for clip_model.token_embedding)
        embed_table = 0.02 * jax.random.normal(keys[4], (vocab_size, ctx_dim), dtype)

        # deterministic synthetic tokenized prompts, shape (num, n_cls, L), int32
        def make_tokens(body_ids):
            toks = [1] + [3] * self.n_ctx + list(body_ids) + [2]
            toks = toks + [0] * (context_length - len(toks))
            row = jnp.asarray(toks[:context_length], dtype=jnp.int32)
            return jnp.tile(row[None, None, :], (1, n_cls, 1))

        tok_pos = make_tokens([4])           # "X X X X object ."
        tok_neg = make_tokens([5, 4])        # "X X X X damaged object ."
        tok_sub = make_tokens([6, 7, 8, 4])  # "X X X X anomaly type of object ."

        # token embeddings, then permute to (n_cls, num, L, D) as in the module
        def embed(tok):
            e = embed_table[tok]                      # (num, n_cls, L, D)
            return jnp.transpose(e, (1, 0, 2, 3))     # (n_cls, num, L, D)

        emb_pos, emb_neg, emb_sub = embed(tok_pos), embed(tok_neg), embed(tok_sub)

        nc = self.n_ctx
        self.token_prefix_pos = emb_pos[:, :, :1, :]
        self.token_suffix_pos = emb_pos[:, :, 1 + nc:, :]
        self.token_prefix_neg = emb_neg[:, :, :1, :]
        self.token_suffix_neg = emb_neg[:, :, 1 + nc:, :]
        self.token_prefix_anomaly_subtype = emb_sub[:, :, :1, :]
        self.token_suffix_anomaly_subtype = emb_sub[:, :, 1 + nc:, :]

        # tokenized prompt buffers, permuted to (n_cls, num, L)
        self.tokenized_prompts_pos = jnp.transpose(tok_pos, (1, 0, 2))
        self.tokenized_prompts_neg = jnp.transpose(tok_neg, (1, 0, 2))
        self.tokenized_prompts_anomaly_subtype = jnp.transpose(tok_sub, (1, 0, 2))

        # ---- hoisted static precomputation (perf) --------------------------
        # (a) Static lane-dense (N, L*D) prompt template: prefix embedding in
        #     lanes [0, D), zeros in the n_ctx learnable slots, suffix
        #     embeddings afterwards.  Built once; forward() only overlays the
        #     learnable ctx lanes inside the Pallas kernel.
        D = ctx_dim
        L = context_length
        n_suf = L - 1 - nc

        def group_template(prefix, suffix):
            g = prefix.shape[0] * prefix.shape[1]
            pre = prefix.reshape(g, 1, D)
            suf = suffix.reshape(g, n_suf, D)
            zeros = jnp.zeros((g, nc, D), dtype)
            return jnp.concatenate([pre, zeros, suf], axis=1)

        template = jnp.concatenate([
            group_template(self.token_prefix_pos, self.token_suffix_pos),
            group_template(self.token_prefix_neg, self.token_suffix_neg),
            group_template(self.token_prefix_anomaly_subtype,
                           self.token_suffix_anomaly_subtype),
        ], axis=0)                                          # (N, L, D)
        self.prompt_template_flat = template.reshape(-1, L * D)   # (N, L*D)

        # (b) Static tokenized-prompt concat (int ids), done once.
        self.tokenized_prompts_all = jnp.concatenate([
            self.tokenized_prompts_pos.reshape(-1, L),
            self.tokenized_prompts_neg.reshape(-1, L),
            self.tokenized_prompts_anomaly_subtype.reshape(-1, L),
        ], axis=0)                                          # (N, L) int32

    def forward(self, cls_id=None):
        # cls_id is accepted and ignored, matching the original forward().
        D = self.ctx_dim
        nc = self.n_ctx
        L = self.context_length

        # Pure (free) reshapes of the learnable parameters to the flat layout.
        ctx_pos = self.ctx_pos.reshape(-1, nc * D)
        ctx_neg = self.ctx_neg.reshape(-1, nc * D)
        ctx_sub = self.ctx_anomaly_subtype.reshape(-1, nc * D)

        # Pallas hot path: single collapsed-grid kernel, one lane-dense
        # full-tile store of the static template + one overlay store per group.
        prompts_flat = assemble_prompts(self.prompt_template_flat,
                                        ctx_pos, ctx_neg, ctx_sub,
                                        n_ctx=nc, ctx_dim=D)
        prompts = prompts_flat.reshape(-1, L, D)            # free minor-dim split

        return prompts, self.tokenized_prompts_all, self.compound_prompts_text


# ----------------------------------- main ----------------------------------- #

if __name__ == "__main__":
    key = jax.random.PRNGKey(0)
    module = CustomAnomalyCLIPPromptLearner2(
        key,
        n_cls=1,
        prompt_length=4,
        ctx_dim=32,
        context_length=16,
        learnable_text_embedding_length=4,
        learnable_text_embedding_depth=3,
    )

    prompts, tokenized_prompts, compound_prompts_text = module.forward()
    prompts = jax.block_until_ready(prompts)
    tokenized_prompts = jax.block_until_ready(tokenized_prompts)

    # pure-JAX reference for the sequence-dim concat, to validate the kernel
    def ref_group(prefix, ctx, suffix):
        return jnp.concatenate([prefix, ctx, suffix], axis=2).reshape(
            -1, module.context_length, module.ctx_dim)

    ref_prompts = jnp.concatenate([
        ref_group(module.token_prefix_pos, module.ctx_pos, module.token_suffix_pos),
        ref_group(module.token_prefix_neg, module.ctx_neg, module.token_suffix_neg),
        ref_group(module.token_prefix_anomaly_subtype, module.ctx_anomaly_subtype,
                  module.token_suffix_anomaly_subtype),
    ], axis=0)

    assert prompts.shape == (3, 16, 32), prompts.shape
    assert tokenized_prompts.shape == (3, 16), tokenized_prompts.shape
    assert tokenized_prompts.dtype == jnp.int32
    assert len(compound_prompts_text) == 2
    assert jnp.allclose(prompts, ref_prompts), "Pallas prompt-assembly mismatch"

    print("KERNEL_OK")
</pallas_src>

<mosaic_0001>
module attributes {stable_mosaic.version = 11 : i64} {
  func.func @_assemble_prompts_kernel(%arg0: memref<3x512xf32, #tpu.memory_space<vmem>>, %arg1: memref<1x128xf32, #tpu.memory_space<vmem>>, %arg2: memref<1x128xf32, #tpu.memory_space<vmem>>, %arg3: memref<1x128xf32, #tpu.memory_space<vmem>>, %arg4: memref<3x512xf32, #tpu.memory_space<vmem>>) attributes {dimension_semantics = [], scalar_prefetch = 0 : i64, scratch_operands = 0 : i64, tpu.core_type = #tpu.core_type<tc>} {
    %c0 = arith.constant 0 : index
    %c0_0 = arith.constant 0 : index
    %0 = vector.load %arg0[%c0, %c0_0] : memref<3x512xf32, #tpu.memory_space<vmem>>, vector<3x512xf32>
    %c0_1 = arith.constant 0 : index
    %c0_2 = arith.constant 0 : index
    %1 = vector.load %arg4[%c0_1, %c0_2] : memref<3x512xf32, #tpu.memory_space<vmem>>, vector<3x512xf32>
    tpu.vector_store %arg4[%c0_1, %c0_2], %0 {strides = array<i32>} : memref<3x512xf32, #tpu.memory_space<vmem>>, vector<3x512xf32>,
    %c0_3 = arith.constant 0 : index
    %c0_4 = arith.constant 0 : index
    %2 = vector.load %arg1[%c0_3, %c0_4] : memref<1x128xf32, #tpu.memory_space<vmem>>, vector<1x128xf32>
    %c0_5 = arith.constant 0 : index
    %c32 = arith.constant 32 : index
    %3 = vector.load %arg4[%c0_5, %c32] : memref<3x512xf32, #tpu.memory_space<vmem>>, vector<1x128xf32>
    tpu.vector_store %arg4[%c0_5, %c32], %2 {strides = array<i32>} : memref<3x512xf32, #tpu.memory_space<vmem>>, vector<1x128xf32>,
    %c0_6 = arith.constant 0 : index
    %c0_7 = arith.constant 0 : index
    %4 = vector.load %arg2[%c0_6, %c0_7] : memref<1x128xf32, #tpu.memory_space<vmem>>, vector<1x128xf32>
    %c1 = arith.constant 1 : index
    %c32_8 = arith.constant 32 : index
    %5 = vector.load %arg4[%c1, %c32_8] : memref<3x512xf32, #tpu.memory_space<vmem>>, vector<1x128xf32>
    tpu.vector_store %arg4[%c1, %c32_8], %4 {strides = array<i32>} : memref<3x512xf32, #tpu.memory_space<vmem>>, vector<1x128xf32>,
    %c0_9 = arith.constant 0 : index
    %c0_10 = arith.constant 0 : index
    %6 = vector.load %arg3[%c0_9, %c0_10] : memref<1x128xf32, #tpu.memory_space<vmem>>, vector<1x128xf32>
    %c2 = arith.constant 2 : index
    %c32_11 = arith.constant 32 : index
    %7 = vector.load %arg4[%c2, %c32_11] : memref<3x512xf32, #tpu.memory_space<vmem>>, vector<1x128xf32>
    tpu.vector_store %arg4[%c2, %c32_11], %6 {strides = array<i32>} : memref<3x512xf32, #tpu.memory_space<vmem>>, vector<1x128xf32>,
    return
  }
}

</mosaic_0001>

<bundles_post_ra>
// kernel: tpu_custom_call.1
= control target key start
LH: loop header
LB: loop body
LE: loop exit
PB: predicated region body
PF: predicated region fallthrough
CT: control target
= control target key end

     0   :  { %9 = vsyncpa [#allocation3], 0  ;;  %s212_s0 = inlined_call_operand.hbm [shape: f32[3,512], index: 0, kind: input, shape index: {}]   ;;  %s213_s1 = inlined_call_operand.vmem [shape: f32[1,128], index: 1, kind: input, shape index: {}]   ;;  %s214_s2 = inlined_call_operand.vmem [shape: f32[1,128], index: 2, kind: input, shape index: {}]   ;;  %s215_s3 = inlined_call_operand.vmem [shape: f32[1,128], index: 3, kind: input, shape index: {}]   ;;  %s216_s4 = inlined_call_operand.hbm [shape: f32[3,512], index: 4, kind: output, shape index: {}]  }
   0x1   :  { %10 = vsyncpa [#allocation4], 0  ;;  %s150_s15 = smov [#allocation2]   ;;  %s102_s19 = scalar_lea.hbm %s212_s0, 256 }
   0x2   :  { %s17_s16 = sshll.u32 %s150_s15, 4  ;;  %p103_p0 = scmp.ne.s32.totalorder %s212_s0, %s102_s19  ;;  %s18_s16 = int_to_ptr.vmem [resolvable:$true] %s17_s16 }
   0x3   :  { %p106_p1 = scmp.lt.u32.totalorder %s102_s19, %s212_s0 }
   0x5   :  { %p108_p2 = pnand %p106_p1, %p103_p0 }
   0x7   :  { %111 = shalt.err (!%p108_p2)
}
   0x8   :  { %s112_s24 = scalar_lea.vmem %s18_s16, 256  ;;  %p117_p4 = scmp.lt.s32.totalorder %s18_s16, %s18_s16 }
   0x9   :  { %p113_p3 = scmp.ne.s32.totalorder %s18_s16, %s112_s24  ;;  %p118_p5 = scmp.lt.s32.totalorder %s112_s24, %s112_s24 }
   0xb   :  { %p119_p6 = por %p118_p5, %p117_p4 }
   0xd   :  { %p120_p7 = pnand %p119_p6, %p113_p3 }
   0xf   :  { %123 = shalt.err (!%p120_p7)
}
  0x10   :  { %20 = dma.hbm_to_vmem [thread:$0]  %s212_s0, 256, %s18_s16, [#allocation3]  }
  0x11   :  { %146 = dma.done.wait [#allocation3], 256  }
  0x12   :  { %147 = vsyncadd [#allocation3], 4294967040  ;;  %v39_v0 = vlaneseq  ;;  %v151_v1 = vmov 286326784   ;;  %v34_v6 = vld [vmem:[%s213_s1] sm:$0x1]  ;;  %s152_s0 = smov 32  }
  0x13   :  { %v37_v2 = vunpack.c.l.s4 %v151_v1  ;;  %v68_v7 = vld [vmem:[%s215_s3] sm:$0x1]  ;;  %v31_v12 = vld [vmem:[#allocation2 + $0x8] sm:$0x77]  ;;  %vm49_vm0 = vcmask 1040640   ;;  %vm50_vm1 = vcmask 258052  }
  0x14   :  { %v40_v3 = vshrl.u32 %v39_v0, 7  ;;  %v53_v8 = vld [vmem:[%s214_s2] sm:$0x1]  ;;  %33 = vst [vmem:[#allocation5 + $0x8] sm:$0x77] %v31_v12  ;;  %vm46_vm2 = vcmask 261120   ;;  %vm51_vm3 = vmor %vm50_vm1, %vm49_vm0 }
  0x15   :  { %v38_v4 = vunpack.c.0.s8 %v37_v2  ;;  %v30_v11 = vld [vmem:[#allocation2] sm:$0x77]  ;;  %s153_s1 = smov [#allocation5]  }
  0x16   :  { %32 = vst [vmem:[#allocation5] sm:$0x77] %v30_v11  ;;  %s89_s2 = sshll.u32 %s153_s1, 4  ;;  %s90_s2 = int_to_ptr.vmem [resolvable:$true] %s89_s2 }
  0x17   :  { %v41_v5 = vsub.s32 %v38_v4, %v40_v3  ;;  %s124_s3 = scalar_lea.vmem %s90_s2, 256  ;;  %p129_p9 = scmp.lt.s32.totalorder %s90_s2, %s90_s2 }
  0x18   :  { %p125_p8 = scmp.ne.s32.totalorder %s90_s2, %s124_s3  ;;  %p130_p10 = scmp.lt.s32.totalorder %s124_s3, %s124_s3 }
  0x19   :  { %v42_v9 = vrot.slane %v34_v6, %v41_v5  ;;  %v76_v10 = vrot.slane %v68_v7, %v41_v5  ;;  %v61_v13 = vrot.slane %v53_v8, %v41_v5 }
  0x1a   :  { %p131_p11 = por %p130_p10, %p129_p9 }
  0x1b   :  { %43 = vrot.lane.b32.xlu0 %v42_v9, %s152_s0  ;;  %77 = vrot.lane.b32.xlu1 %v76_v10, %s152_s0 }
  0x1c   :  { %p132_p12 = pnand %p131_p11, %p125_p8 }
  0x1f   :  { %62 = vrot.lane.b32.xlu0 %v61_v13, %s152_s0 }
  0x8d   :  { %v44_v14 = vpop.permute.xlu0 %43  ;;  %v78_v15 = vpop.permute.xlu1 %77 }
  0x8e   :  { %v45_v16 = vrot.slane %v44_v14, 4  ;;  %v79_v17 = vrot.slane %v78_v15, 4 }
  0x90   :  { %v47_v18 = vsel %vm46_vm2, %v45_v16, %v44_v14  ;;  %v80_v19 = vsel %vm46_vm2, %v79_v17, %v78_v15 }
  0x91   :  { %52 = vst.msk [vmem:[#allocation5] sm:$0x11] %vm51_vm3, %v47_v18  ;;  %82 = vst.msk [vmem:[#allocation5 + $0x2] sm:$0x11] %vm51_vm3, %v80_v19  ;;  %v63_v20 = vpop.permute.xlu0 %62 }
  0x92   :  { %v64_v21 = vrot.slane %v63_v20, 4 }
  0x94   :  { %v65_v22 = vsel %vm46_vm2, %v64_v21, %v63_v20 }
  0x95   :  { %67 = vst.msk [vmem:[#allocation5 + $0x1] sm:$0x11] %vm51_vm3, %v65_v22 }
  0x96   :  { %135 = shalt.err (!%p132_p12)
}
  0x97   :  { %s136_s9 = scalar_lea.hbm %s216_s4, 256 }
  0x98   :  { %p137_p13 = scmp.ne.s32.totalorder %s216_s4, %s136_s9  ;;  %p140_p0 = scmp.lt.u32.totalorder %s136_s9, %s216_s4 }
  0x9a   :  { %p142_p1 = pnand %p140_p0, %p137_p13 }
  0x9c   :  { %145 = shalt.err (!%p142_p1)
}
  0x9d   :  { %92 = dma.vmem_to_hbm [thread:$0]  %s90_s2, 256, %s216_s4, [#allocation4]  }
  0x9e   :  { %148 = dma.done.wait [#allocation4], 256  }
  0x9f   :  { %149 = vsyncadd [#allocation4], 4294967040 }
  0xa0   :  { %96 = vsyncpa [#allocation3], 1 }
  0xa1   :  { %97 = vsyncpa [#allocation4], 1 }

</bundles_post_ra>
